<compile_context>
chip_gen: v7x
topology: tpu7x:2x2x1
jax: 0.10.0
libtpu: 0.0.40
codegen_flags: <defaults>
</compile_context>

<pallas_src>
import jax
import jax.numpy as jnp
import numpy as np
from jax.experimental import pallas as pl
from jax.experimental.pallas import tpu as pltpu


def _images_per_step(n):
    """Images packed per grid step: amortize per-step overhead, keep >=2 steps."""
    for b in (8, 4, 2):
        if n % b == 0 and n // b >= 2:
            return b
    return 1


def basic_conv2d(x, weight, gamma, beta, running_mean, running_var,
                 *, eps=1e-3, padding=1):
    """Fused Conv2d(bias=False, stride=1) + BatchNorm2d(eval) + ReLU.

    x: (N, Cin, H, W) f32; weight: (Cout, Cin, KH, KW) f32.
    Returns (N, Cout, Ho, Wo) f32 (PyTorch eval-mode module semantics).
    """
    N, Cin, H, W = x.shape
    Cout, _, KH, KW = weight.shape
    p = padding
    Ho, Wo = H + 2 * p - KH + 1, W + 2 * p - KW + 1
    HWo = Ho * Wo
    K = KH * KW * Cin                         # fused contraction dim (taps*Cin)

    # ---- glue: extract patches straight from NCHW (lane-packs Cin=4 into K=36,
    # removes both NCHW<->NHWC transposes from the hot path).
    # TODO(synk): for large Cin switch to W-only patching (3x traffic) with the
    # KH row shift fused in-kernel instead of materializing all taps*Cin here.
    xp = jnp.pad(x, ((0, 0), (0, 0), (p, p), (p, p)))             # (N,Cin,Hp,Wp)
    taps = [xp[:, :, kh:kh + Ho, kw:kw + Wo]
            for kh in range(KH) for kw in range(KW)]              # (N,Cin,Ho,Wo)
    patches = jnp.stack(taps, axis=1)                             # (N,taps,Cin,Ho,Wo)
    patches = patches.reshape(N, K, HWo).astype(jnp.bfloat16)     # k = tap*Cin + c

    # ---- glue: fold BN (eval / running stats) into weight & bias.
    scale = gamma / jnp.sqrt(running_var + eps)                   # (Cout,)
    bias = (beta - running_mean * scale).reshape(Cout, 1).astype(jnp.float32)
    w2 = jnp.transpose(weight, (0, 2, 3, 1)).reshape(Cout, K)     # k = tap*Cin + c
    w2 = (w2 * scale[:, None]).astype(jnp.bfloat16)

    B = _images_per_step(N)                                       # images / step

    def kernel(x_ref, w_ref, b_ref, o_ref):
        # x_ref: (B, K, HWo) bf16 -- patches for B images
        # w_ref: (Cout, K)   bf16 -- BN-folded conv weights (resident)
        # b_ref: (Cout, 1)   f32  -- folded BN bias (resident)
        # o_ref: (B, Cout, HWo)   -- channel-major (NCHW-ordered) output
        w = w_ref[...]
        b = b_ref[...]
        for i in range(B):                                        # static unroll
            # Single K-fused MXU dot; result stays a value (no VMEM RMW).
            y = jnp.dot(w, x_ref[i], preferred_element_type=jnp.float32)
            o_ref[i] = jnp.maximum(y + b, 0.0).astype(o_ref.dtype)

    out = pl.pallas_call(
        kernel,
        out_shape=jax.ShapeDtypeStruct((N, Cout, HWo), x.dtype),
        grid_spec=pltpu.PrefetchScalarGridSpec(
            num_scalar_prefetch=0,
            grid=(N // B,),
            in_specs=[
                pl.BlockSpec((B, K, HWo), lambda n: (n, 0, 0)),
                pl.BlockSpec((Cout, K), lambda n: (0, 0)),
                pl.BlockSpec((Cout, 1), lambda n: (0, 0)),
            ],
            out_specs=pl.BlockSpec((B, Cout, HWo), lambda n: (n, 0, 0)),
        ),
        compiler_params=pltpu.CompilerParams(
            dimension_semantics=("parallel",)),
    )(patches, w2, bias)

    # Already NCHW-ordered and unpadded: just restore the spatial dims.
    return out.reshape(N, Cout, Ho, Wo)


def reference(x, weight, gamma, beta, running_mean, running_var,
              *, eps=1e-3, padding=1):
    y = jax.lax.conv_general_dilated(
        x, weight, window_strides=(1, 1),
        padding=[(padding, padding), (padding, padding)],
        dimension_numbers=("NCHW", "OIHW", "NCHW"))
    s = (gamma / jnp.sqrt(running_var + eps)).reshape(1, -1, 1, 1)
    b = (beta - running_mean * gamma / jnp.sqrt(running_var + eps)).reshape(1, -1, 1, 1)
    return jnp.maximum(y * s + b, 0.0)


if __name__ == "__main__":
    # BasicConv2d(in_channels=4, out_channels=8, kernel_size=3, padding=1)
    N, Cin, H, W = 2, 4, 16, 16
    Cout, KH, KW = 8, 3, 3

    key = jax.random.PRNGKey(0)
    kx, kw, kg, kb, km, kv = jax.random.split(key, 6)
    x = jax.random.normal(kx, (N, Cin, H, W), dtype=jnp.float32)
    weight = jax.random.normal(kw, (Cout, Cin, KH, KW), dtype=jnp.float32) * 0.1
    gamma = jax.random.normal(kg, (Cout,), dtype=jnp.float32) * 0.1 + 1.0
    beta = jax.random.normal(kb, (Cout,), dtype=jnp.float32) * 0.1
    running_mean = jax.random.normal(km, (Cout,), dtype=jnp.float32) * 0.1
    running_var = jax.random.uniform(kv, (Cout,), dtype=jnp.float32,
                                     minval=0.5, maxval=1.5)

    y = basic_conv2d(x, weight, gamma, beta, running_mean, running_var)
    y = jax.block_until_ready(y)

    y_ref = reference(x, weight, gamma, beta, running_mean, running_var)
    # bf16 MXU operands (f32 accumulation) -> relaxed tolerance vs f32 ref.
    np.testing.assert_allclose(np.asarray(y), np.asarray(y_ref),
                               rtol=3e-2, atol=3e-2)

    print("KERNEL_OK")
</pallas_src>

<mosaic_0001>
module attributes {stable_mosaic.version = 11 : i64} {
  func.func @kernel(%arg0: i32, %arg1: memref<1x36x256xbf16, #tpu.memory_space<vmem>>, %arg2: memref<8x36xbf16, #tpu.memory_space<vmem>>, %arg3: memref<8x1xf32, #tpu.memory_space<vmem>>, %arg4: memref<1x8x256xf32, #tpu.memory_space<vmem>>) attributes {dimension_semantics = [#tpu.dimension_semantics<parallel>], iteration_bounds = array<i64: 2>, scalar_prefetch = 0 : i64, scratch_operands = 0 : i64, tpu.core_type = #tpu.core_type<tc>, window_params = [{transform_indices = @transform_0, window_bounds = array<i64: 1, 36, 256>}, {pipeline_mode = #tpu.pipeline_mode<synchronous>, transform_indices = @transform_1, window_bounds = array<i64: 8, 36>}, {pipeline_mode = #tpu.pipeline_mode<synchronous>, transform_indices = @transform_2, window_bounds = array<i64: 8, 1>}, {transform_indices = @transform_3, window_bounds = array<i64: 1, 8, 256>}]} {
    %c0 = arith.constant 0 : index
    %c0_0 = arith.constant 0 : index
    %0 = vector.load %arg2[%c0, %c0_0] : memref<8x36xbf16, #tpu.memory_space<vmem>>, vector<8x36xbf16>
    %c0_1 = arith.constant 0 : index
    %c0_2 = arith.constant 0 : index
    %1 = vector.load %arg3[%c0_1, %c0_2] : memref<8x1xf32, #tpu.memory_space<vmem>>, vector<8x1xf32>
    %c0_3 = arith.constant 0 : index
    %c0_4 = arith.constant 0 : index
    %c0_5 = arith.constant 0 : index
    %2 = vector.load %arg1[%c0_3, %c0_4, %c0_5] : memref<1x36x256xbf16, #tpu.memory_space<vmem>>, vector<1x36x256xbf16>
    %3 = vector.shape_cast %2 : vector<1x36x256xbf16> to vector<36x256xbf16>
    %cst = arith.constant dense<0.000000e+00> : vector<8x256xf32>
    %4 = tpu.matmul %0, %3, %cst {dimension_numbers = #tpu.dot_dimension_numbers<[1], [0], [0], [1], [0, 0, 1, 1], [], []>} : vector<8x36xbf16>, vector<36x256xbf16>, vector<8x256xf32> -> vector<8x256xf32>
    %5 = vector.broadcast %1 : vector<8x1xf32> to vector<8x256xf32>
    %6 = arith.addf %4, %5 : vector<8x256xf32>
    %cst_6 = arith.constant 0.000000e+00 : f32
    %7 = vector.broadcast %cst_6 : f32 to vector<8x256xf32>
    %8 = arith.maximumf %6, %7 : vector<8x256xf32>
    %c0_7 = arith.constant 0 : index
    %c0_8 = arith.constant 0 : index
    %c0_9 = arith.constant 0 : index
    %9 = vector.load %arg4[%c0_7, %c0_8, %c0_9] : memref<1x8x256xf32, #tpu.memory_space<vmem>>, vector<1x8x256xf32>
    %10 = vector.shape_cast %9 : vector<1x8x256xf32> to vector<8x256xf32>
    %11 = vector.shape_cast %8 : vector<8x256xf32> to vector<1x8x256xf32>
    tpu.vector_store %arg4[%c0_7, %c0_8, %c0_9], %11 {strides = array<i32>} : memref<1x8x256xf32, #tpu.memory_space<vmem>>, vector<1x8x256xf32>,
    return
  }
  func.func @transform_0(%arg0: i32) -> (i32, i32, i32) {
    %c0_i32 = arith.constant 0 : i32
    %c0_i32_0 = arith.constant 0 : i32
    %c0_i32_1 = arith.constant 0 : i32
    return %arg0, %c0_i32, %c0_i32_0 : i32, i32, i32
  }
  func.func @transform_1(%arg0: i32) -> (i32, i32) {
    %c0_i32 = arith.constant 0 : i32
    %c0_i32_0 = arith.constant 0 : i32
    %c0_i32_1 = arith.constant 0 : i32
    return %c0_i32, %c0_i32_0 : i32, i32
  }
  func.func @transform_2(%arg0: i32) -> (i32, i32) {
    %c0_i32 = arith.constant 0 : i32
    %c0_i32_0 = arith.constant 0 : i32
    %c0_i32_1 = arith.constant 0 : i32
    return %c0_i32, %c0_i32_0 : i32, i32
  }
  func.func @transform_3(%arg0: i32) -> (i32, i32, i32) {
    %c0_i32 = arith.constant 0 : i32
    %c0_i32_0 = arith.constant 0 : i32
    %c0_i32_1 = arith.constant 0 : i32
    return %arg0, %c0_i32, %c0_i32_0 : i32, i32, i32
  }
}

</mosaic_0001>

<bundles_post_ra>
// kernel: tpu_custom_call.1
= control target key start
LH: loop header
LB: loop body
LE: loop exit
PB: predicated region body
PF: predicated region fallthrough
CT: control target
= control target key end

     0   :  { %8 = vsyncpa [#allocation3], 0  ;;  %s599_s0 = inlined_call_operand.vmem [shape: bf16[2,36,256], index: 0, kind: input, shape index: {}]   ;;  %s600_s1 = inlined_call_operand.vmem [shape: bf16[8,36], index: 1, kind: input, shape index: {}]   ;;  %s601_s2 = inlined_call_operand.vmem [shape: f32[8,1], index: 2, kind: input, shape index: {}]   ;;  %s602_s3 = inlined_call_operand.hbm [shape: f32[2,8,256], index: 3, kind: output, shape index: {}]  }
   0x1   :  { %10 = vsyncpa [#allocation3 + $0x1], 0  ;;  %s493_s12 = smov 0   ;;  %s495_s13 = smov 0  }
   0x2   :  { %s497_s14 = smov 0   ;;  %s499_s15 = smov 0  }
   0x3 LB: > { %s514_s16 = sadd.s32 4294967295, %s469_s15   ;;  %s337_s17 = sadd.s32 4294967294, %s469_s15   ;;  %s469_s15 = sphi %s499_s15, %s608_s15   ;;  %s465_s14 = sphi %s497_s14, %s607_s14   ;;  %s461_s13 = sphi %s495_s13, %s606_s13   ;;  %s457_s12 = sphi %s493_s12, %s605_s12  }
   0x4   : > { %s518_s18 = sadd.s32 1, %s469_s15   ;;  %s91_s19 = sadd.s32 1, %s465_s14 }
   0x5   : > { %s88_s20 = ssub.s32 %s469_s15, %s518_s18  ;;  %p101_p0 = scmp.ne.s32.totalorder %s465_s14, %s461_s13 }
   0x6   : > { %p89_p1 = scmp.eq.s32.totalorder %s88_s20, 0  ;;  %p102_p2 = scmp.eq.s32.totalorder %s514_s16, 1 }
   0x7   : > { %p107_p3 = scmp.ne.s32.totalorder %s461_s13, %s457_s12  ;;  %p108_p4 = scmp.eq.s32.totalorder %s337_s17, 1 }
   0x8   : > { %s529_s21 = scalar_select %p89_p1, %s465_s14, %s91_s19  }
   0x9   : > { %p531_p5 = por %p102_p2, %p101_p0  ;;  %p535_p6 = por %p108_p4, %p107_p3 }
   0xa   : > { %p340_p7 = scmp.ge.s32.totalorder %s469_s15, 1  ;;  %p140_p8 = scmp.lt.s32.totalorder %s469_s15, 3 }
   0xc   : > { %p141_p9 = pnand %p340_p7, %p140_p8 }
   0xd   : > { %p164_p10 = scmp.lt.s32.totalorder (!%p141_p9), %s514_s16, 1  ;;  %v471_v0 = vmov (!%p141_p9), 0   ;;  %v171_v1 = vld [vmem:[%s601_s2] sm:$0xff] (!%p141_p9)  ;;  %vm211_vm0 = vcmask (!%p141_p9), 1041408   ;;  %vm207_vm1 = vcmask (!%p141_p9), 293888   ;;  %s161_s6 = sand.u32 (!%p141_p9), 1, %s461_s13  }
   0xe   : > { %144 = sbr.rel (%p141_p9) target bundleno = 270 (0x10e), region = 32  ;;  %250 = vmatprep.mubr.bf16.mxu0 (!%p141_p9), %v471_v0  ;;  %398 = vset.pattern.permute.xlu0 (!%p141_p9), %v471_v0  ;;  %v170_v10 = vld [vmem:[%s600_s1] sm:$0xf] (!%p141_p9)  ;;  %s341_s7 = sshll.u32 (!%p141_p9), %s161_s6, 4 }
   0xf   : > { %179 = vperm.xlu0 (!%p141_p9), %398, %v171_v1   ;;  %s356_s8 = sshll.u32 (!%p141_p9), %s514_s16, 8  ;;  %s163_s9 = scalar_lea.vmem (!%p141_p9), [#allocation2], %s341_s7 }
  0x10   : > { %s278_s10 = sshll.u32 (!%p141_p9), %s163_s9, 4  ;;  %s557_s19 = scalar_lea.hbm (!%p141_p9), %s602_s3, %s356_s8  ;;  %s559_s10 = int_to_ptr.vmem [resolvable:$true] %s278_s10 }
  0x11   : > { %s407_s20 = scalar_lea.vmem (!%p141_p9), %s559_s10, 256  ;;  %s472_s24 = smov (!%p141_p9), [#allocation2]  }
  0x12   : > { %p408_p11 = scmp.ne.s32.totalorder (!%p141_p9), %s559_s10, %s407_s20  ;;  %s411_s25 = sshll.u32 (!%p141_p9), %s472_s24, 4  ;;  %s412_s25 = int_to_ptr.vmem [resolvable:$false] %s411_s25 }
  0x13   : > { %p414_p0 = scmp.lt.s32.totalorder (!%p141_p9), %s559_s10, %s412_s25 }
  0x14   : > { %p409_p12 = pnand (!%p141_p9), %p408_p11, %p531_p5 }
  0x15   : > { %s165_s26 = scalar_select %p164_p10, %s514_s16, 1 }
  0x16   : > { %s264_s16 = scalar_lea.sflag [#allocation3], %s161_s6  ;;  %p410_p13 = pneg %p409_p12 }
  0x17   : > { %s357_s27 = smul.u32 40, %s165_s26  ;;  %s413_s26 = scalar_lea.vmem %s412_s25, 512 }
  0x18   : > { %p415_p1 = scmp.lt.s32.totalorder %s413_s26, %s407_s20 }
  0x19   : > { %s168_s30 = scalar_lea.vmem %s599_s0, %s357_s27 }
  0x1a   : > { %v399_v2 = vld [vmem:[%s168_s30 + $0x4] ss:$8 sps:$4 sm:$0xff]   ;;  %v401_v3 = vld [vmem:[%s168_s30] ss:$8 sps:$4 sm:$0xff]   ;;  %v402_v4 = vld [vmem:[%s168_s30 + $0x14] ss:$8 sps:$4 sm:$0xff]   ;;  %p416_p2 = por %p415_p1, %p414_p0 }
  0x1b   : > { %218 = vmatprep.subr.bf16.mxu0 %v399_v2  ;;  %v176_v5 = vld [vmem:[%s168_s30 + $0x20] sm:$0x33]  ;;  %v404_v6 = vld [vmem:[%s168_s30 + $0x10] ss:$8 sps:$4 sm:$0xff]  }
  0x1c   : > { %219 = vmatpush1.bf16.msra.mxu0 %v401_v3  ;;  %v348_v7 = vcombine.high %v176_v5, %v176_v5  ;;  %v347_v8 = vcombine.low %v176_v5, %v176_v5  ;;  %p417_p3 = pnand %p416_p2, %p410_p13 }
  0x1d   : > { %220 = vmatprep.subr.bf16.mxu0 %v402_v4 }
  0x1e   : > { %v213_v9 = vsel %vm211_vm0, %v347_v8, 0 }
  0x20   : > { %221 = vmatpush1.bf16.msra.mxu0 %v404_v6 }
  0x21   : > { %349 = vmatprep.subr.msk.bf16.mxu0 %vm211_vm0, %v348_v7 }
  0x24   : > { %223 = vmatpush1.bf16.msra.mxu0 %v213_v9 }
  0x27   : > { %350 = vmatmul.mubr.msk.bf16.vlgmr.msra.gmra.mrb[0].mxu0 %vm207_vm1, %v170_v10 }
  0x8e   : > { %v180_v11 = vpop.permute.xlu0 %179 }
  0xfa   : > { %v252_v12 = vpop.f32.mrb[0].mxu0 }
  0xfb   : > { %v253_v13 = vadd.f32 %v252_v12, %v180_v11  ;;  %v254_v14 = vpop.f32.mrb[1].mxu0 }
  0xfc   : > { %v255_v15 = vadd.f32 %v254_v14, %v180_v11  ;;  %v256_v16 = vpop.f32.mrb[2].mxu0 }
  0xfd   : > { %v259_v17 = vmax.f32 %v253_v13, 0.0  ;;  %v257_v18 = vpop.f32.mrb[3].mxu0 }
  0xfe   : > { %v260_v19 = vmax.f32 %v255_v15, 0.0 }
  0xff   : > { %261 = vst [vmem:[%s163_s9] sm:$0xff] %v259_v17 }
 0x100   : > { %262 = vst [vmem:[%s163_s9 + $0x8] sm:$0xff] %v260_v19 }
 0x101   : > { %420 = shalt.err (!%p417_p3)
}
 0x102   : > { %s421_s27 = scalar_lea.hbm %s557_s19, 256  ;;  %s425_s30 = scalar_lea.hbm %s602_s3, 512 }
 0x103   : > { %p422_p4 = scmp.ne.s32.totalorder %s557_s19, %s421_s27  ;;  %p426_p9 = scmp.lt.u32.totalorder %s557_s19, %s602_s3 }
 0x104   : > { %p427_p10 = scmp.lt.u32.totalorder %s425_s30, %s421_s27  ;;  %p429_p12 = scmp.lt.u32.totalorder %s421_s27, %s557_s19 }
 0x105   : > { %p423_p7 = pnand %p422_p4, %p531_p5 }
 0x106   : > { %p428_p11 = por %p427_p10, %p426_p9 }
 0x107   : > { %p424_p8 = pneg %p423_p7 }
 0x108   : > { %p430_p13 = por %p429_p12, %p428_p11 }
 0x10a   : > { %p431_p0 = pnand %p430_p13, %p424_p8 }
 0x10c   : > { %434 = shalt.err (!%p431_p0)
}
 0x10d   : > { %358 = dma.vmem_to_hbm [thread:$0]  (%p531_p5), %s559_s10, 256, %s557_s19, %s264_s16  }
 0x10e PF: > { %p364_p1 = scmp.ge.s32.totalorder %s469_s15, 2  ;;  %s290_s6 = sand.u32 1, %s457_s12  }
 0x10f   : > { %s291_s7 = scalar_lea.sflag [#allocation3], %s290_s6 }
 0x110   : > { %p361_p2 = pnand %p364_p1, %p535_p6 }
 0x112   : > { %452 = dma.done.wait (!%p361_p2), %s291_s7, 256  }
 0x113   : > { %454 = vsyncadd (!%p361_p2), %s291_s7, 4294967040  ;;  %p13_p3 = scmp.ge.s32.totalorder %s518_s18, 4   ;;  %s605_s12 = smov %s461_s13 }
 0x114   : > { %s606_s13 = smov %s465_s14  ;;  %s607_s14 = smov %s529_s21 }
 0x115   : > { %s608_s15 = smov %s518_s18  ;;  %15 = sbr.rel (!%p13_p3) target bundleno = 3 (0x3), region = 67 }
 0x11c   :  { %296 = vsyncpa [#allocation3], 1 }
 0x11d   :  { %298 = vsyncpa [#allocation3 + $0x1], 1 }

</bundles_post_ra>
